<compile_context>
chip_gen: v7x
topology: tpu7x:2x2x1
jax: 0.10.0
libtpu: 0.0.40
codegen_flags: <defaults>
</compile_context>

<pallas_src>
import functools

import numpy as np
import jax
import jax.numpy as jnp
from jax.experimental import pallas as pl
from jax.experimental.pallas import tpu as pltpu


def _layer_norm(x, g, b, eps=1e-5):
    mu = jnp.mean(x, axis=-1, keepdims=True)
    var = jnp.mean((x - mu) ** 2, axis=-1, keepdims=True)
    return (x - mu) * jax.lax.rsqrt(var + eps) * g + b


# ----------------------------------------------------------------------------
# K1: q = hq_func(h)        (grid over node tiles)
# ----------------------------------------------------------------------------
def _hq_kernel(h_ref, w1, b1, lng, lnb, w2, b2, q_ref):
    x = jnp.dot(h_ref[...], w1[...], preferred_element_type=jnp.float32) + b1[...]
    x = jnp.maximum(_layer_norm(x, lng[...], lnb[...]), 0.0)
    q_ref[...] = jnp.dot(x, w2[...], preferred_element_type=jnp.float32) + b2[...]


# ----------------------------------------------------------------------------
# K2: per-edge compute (edges pre-sorted by dst, pre-gathered & concatenated)
#   kv feature layout: [edge_feat | r_feat | h_dst | h_src]
# ----------------------------------------------------------------------------
def _edge_kernel(kv_ref, qd_ref,
                 w1, b1, lnkg, lnkb, lnvg, lnvb,
                 w2k, b2k, w2v, b2v, eww, ewb, hsum,
                 v_ref, s_ref, *, hidden, ef_dim, rf_dim):
    kv = kv_ref[...]
    # fused first layer of hk_func / hv_func (one matmul, 2*hidden output lanes)
    pre = jnp.dot(kv, w1[...], preferred_element_type=jnp.float32) + b1[...]
    hk = jnp.maximum(_layer_norm(pre[:, :hidden], lnkg[...], lnkb[...]), 0.0)
    hv = jnp.maximum(_layer_norm(pre[:, hidden:], lnvg[...], lnvb[...]), 0.0)
    k = jnp.dot(hk, w2k[...], preferred_element_type=jnp.float32) + b2k[...]
    v = jnp.dot(hv, w2v[...], preferred_element_type=jnp.float32) + b2v[...]

    # ew_net (ew_net_type == 'r'): sigmoid(Linear(r_feat))
    r = kv[:, ef_dim:ef_dim + rf_dim]
    e_w = jax.nn.sigmoid(
        jnp.dot(r, eww[...], preferred_element_type=jnp.float32) + ewb[...])

    v_ref[...] = v * e_w
    # per-head (q*k).sum/sqrt(d) via a head-sum matrix (1/sqrt(d) folded in)
    s_ref[...] = jnp.dot(qd_ref[...] * k, hsum[...],
                         preferred_element_type=jnp.float32)


# ----------------------------------------------------------------------------
# K3: segmented softmax + weighted aggregation over dst-sorted edges.
#   grid = (node_tiles, K); K = max #edge-chunks any node tile touches.
#   chunk_lo / n_chunks are scalar-prefetched and drive the chunk index maps.
#   Scores arrive already shifted by the per-destination segment max, so the
#   softmax numerator exp() is per-edge, and both the denominator and the
#   weighted sum are MXU matmuls against a (T_n, C) one-hot match matrix.
#   The output block is resident across the chunk axis (accumulator).
# ----------------------------------------------------------------------------
def _aggr_kernel(clo_ref, ncnt_ref,                # scalar prefetch (SMEM)
                 dst_ref, sc_ref, v_ref, hexp_ref,  # (1,C) i32, (C,H), (C,D), (H,D)
                 out_ref,                           # (T_n, D), resident over k
                 l_sc,                              # scratch (T_n, H) softmax denominator
                 *, node_tile, edge_tile):
    i = pl.program_id(0)
    k = pl.program_id(1)

    @pl.when(k == 0)
    def _():
        out_ref[...] = jnp.zeros_like(out_ref)
        l_sc[...] = jnp.zeros_like(l_sc)

    @pl.when(k < ncnt_ref[i])
    def _():
        node_base = i * node_tile
        rows = jax.lax.broadcasted_iota(jnp.int32, (node_tile, edge_tile), 0)
        match = (rows == (dst_ref[...] - node_base)).astype(jnp.float32)  # (T_n, C)
        p = jnp.exp(sc_ref[...])                                          # (C, H)
        # expand per-head weights to feature lanes with a tiny MXU matmul
        msg = v_ref[...] * jnp.dot(p, hexp_ref[...],
                                   preferred_element_type=jnp.float32)    # (C, D)
        out_ref[...] += jnp.dot(match, msg, preferred_element_type=jnp.float32)
        l_sc[...] += jnp.dot(match, p, preferred_element_type=jnp.float32)

    @pl.when(k == pl.num_programs(1) - 1)
    def _():
        l = l_sc[...]
        safe = jnp.where(l > 0.0, l, 1.0)            # isolated / padded nodes -> 0
        denom = jnp.dot(safe, hexp_ref[...], preferred_element_type=jnp.float32)
        out_ref[...] = out_ref[...] / denom


# ----------------------------------------------------------------------------
# K4: out = node_output(cat([aggr, h])) + h     (concat folded into split W1)
# ----------------------------------------------------------------------------
def _out_kernel(a_ref, h_ref, w1a, w1h, b1, lng, lnb, w2, b2, out_ref):
    pre = (jnp.dot(a_ref[...], w1a[...], preferred_element_type=jnp.float32)
           + jnp.dot(h_ref[...], w1h[...], preferred_element_type=jnp.float32)
           + b1[...])
    x = jnp.maximum(_layer_norm(pre, lng[...], lnb[...]), 0.0)
    out_ref[...] = (jnp.dot(x, w2[...], preferred_element_type=jnp.float32)
                    + b2[...] + h_ref[...])


# ----------------------------------------------------------------------------
# Wrapper
# ----------------------------------------------------------------------------
def base_x2h_att_forward(h, r_feat, edge_feat, edge_index, params, *,
                         n_heads, node_tile=128, edge_tile=512):
    N, in_dim = h.shape
    E, rf_dim = r_feat.shape
    ef_dim = edge_feat.shape[1]
    hidden = params["q_b1"].shape[-1]
    out_dim = params["q_b2"].shape[-1]
    assert out_dim % n_heads == 0
    assert hidden == in_dim, "residual (output + h) requires hidden_dim == input_dim"
    head_dim = out_dim // n_heads

    nT = pl.cdiv(N, node_tile)
    N_pad = nT * node_tile
    eT = pl.cdiv(E, edge_tile)
    E_pad = eT * edge_tile
    total_chunks = eT

    h_pad = jnp.pad(h.astype(jnp.float32), ((0, N_pad - N), (0, 0)))
    full = lambda i: (0, 0)

    # ---- K1: q = hq_func(h) ------------------------------------------------
    q_w = [params[k] for k in ("q_w1", "q_b1", "q_ln_g", "q_ln_b", "q_w2", "q_b2")]
    q = pl.pallas_call(
        _hq_kernel,
        out_shape=jax.ShapeDtypeStruct((N_pad, out_dim), jnp.float32),
        grid_spec=pltpu.PrefetchScalarGridSpec(
            num_scalar_prefetch=0, grid=(nT,),
            in_specs=[pl.BlockSpec((node_tile, in_dim), lambda i: (i, 0))]
                     + [pl.BlockSpec(w.shape, full) for w in q_w],
            out_specs=pl.BlockSpec((node_tile, out_dim), lambda i: (i, 0)),
        ),
        compiler_params=pltpu.CompilerParams(dimension_semantics=("parallel",)),
    )(h_pad, *q_w)

    # ---- glue: sort edges by dst, gather per-edge inputs, chunk offsets ----
    # TODO(synk): data-dependent gathers / argsort / searchsorted / segment_max
    #             stay as XLA glue; a manual-DMA gather inside the kernel is not
    #             worth it at these feature widths.
    src = edge_index[0].astype(jnp.int32)
    dst = edge_index[1].astype(jnp.int32)
    order = jnp.argsort(dst)
    dst_s, src_s = dst[order], src[order]
    kv_s = jnp.concatenate(
        [edge_feat[order], r_feat[order], h[dst_s], h[src_s]], axis=-1
    ).astype(jnp.float32)
    qd_s = q[dst_s]

    pad_e = E_pad - E
    kv_s = jnp.pad(kv_s, ((0, pad_e), (0, 0)))
    qd_s = jnp.pad(qd_s, ((0, pad_e), (0, 0)))
    dst_pad = jnp.pad(dst_s, (0, pad_e), constant_values=N_pad).reshape(1, E_pad)

    seg = jnp.searchsorted(dst_s, jnp.arange(N_pad + 1, dtype=jnp.int32)).astype(jnp.int32)
    lo_e = seg[jnp.arange(nT, dtype=jnp.int32) * node_tile]
    hi_e = seg[(jnp.arange(nT, dtype=jnp.int32) + 1) * node_tile]
    chunk_lo = (lo_e // edge_tile).astype(jnp.int32)
    chunk_hi = (hi_e + edge_tile - 1) // edge_tile
    n_chunks = (chunk_hi - chunk_lo).astype(jnp.int32)
    K = max(int(jnp.max(n_chunks)), 1)

    # head <-> feature-lane expansion matrices
    hexp = jnp.repeat(jnp.eye(n_heads, dtype=jnp.float32), head_dim, axis=1)   # (H, D)
    hsum = (hexp.T / np.sqrt(head_dim)).astype(jnp.float32)                     # (D, H)

    # ---- K2: per-edge k / v*e_w / scores ------------------------------------
    w1_cat = jnp.concatenate([params["k_w1"], params["v_w1"]], axis=1)
    b1_cat = jnp.concatenate([params["k_b1"], params["v_b1"]], axis=1)
    edge_w = [w1_cat, b1_cat,
              params["k_ln_g"], params["k_ln_b"], params["v_ln_g"], params["v_ln_b"],
              params["k_w2"], params["k_b2"], params["v_w2"], params["v_b2"],
              params["ew_w"], params["ew_b"], hsum]

    v_s, s_s = pl.pallas_call(
        functools.partial(_edge_kernel, hidden=hidden, ef_dim=ef_dim, rf_dim=rf_dim),
        out_shape=(jax.ShapeDtypeStruct((E_pad, out_dim), jnp.float32),
                   jax.ShapeDtypeStruct((E_pad, n_heads), jnp.float32)),
        grid_spec=pltpu.PrefetchScalarGridSpec(
            num_scalar_prefetch=0, grid=(eT,),
            in_specs=[pl.BlockSpec((edge_tile, kv_s.shape[1]), lambda i: (i, 0)),
                      pl.BlockSpec((edge_tile, out_dim), lambda i: (i, 0))]
                     + [pl.BlockSpec(w.shape, full) for w in edge_w],
            out_specs=[pl.BlockSpec((edge_tile, out_dim), lambda i: (i, 0)),
                       pl.BlockSpec((edge_tile, n_heads), lambda i: (i, 0))],
        ),
        compiler_params=pltpu.CompilerParams(dimension_semantics=("parallel",)),
    )(kv_s, qd_s, *edge_w)

    # scatter_softmax stabilisation: shift scores by the per-destination segment
    # max (exact reference semantics); tiny (E, H) arrays, XLA glue.
    s_valid = s_s[:E]
    m_seg = jax.ops.segment_max(s_valid, dst_s, num_segments=N,
                                indices_are_sorted=True)
    s_shift = s_valid - m_seg[dst_s]
    sc_pad = jnp.pad(s_shift, ((0, pad_e), (0, 0)), constant_values=-1e30)

    # ---- K3: sorted-segment softmax + aggregation ---------------------------
    chunk_map = lambda i, k, clo, cnt: jnp.minimum(clo[i] + k, total_chunks - 1)
    aggr = pl.pallas_call(
        functools.partial(_aggr_kernel, node_tile=node_tile, edge_tile=edge_tile),
        out_shape=jax.ShapeDtypeStruct((N_pad, out_dim), jnp.float32),
        grid_spec=pltpu.PrefetchScalarGridSpec(
            num_scalar_prefetch=2, grid=(nT, K),
            in_specs=[
                pl.BlockSpec((1, edge_tile),
                             lambda i, k, clo, cnt: (0, chunk_map(i, k, clo, cnt))),
                pl.BlockSpec((edge_tile, n_heads),
                             lambda i, k, clo, cnt: (chunk_map(i, k, clo, cnt), 0)),
                pl.BlockSpec((edge_tile, out_dim),
                             lambda i, k, clo, cnt: (chunk_map(i, k, clo, cnt), 0)),
                pl.BlockSpec((n_heads, out_dim),
                             lambda i, k, clo, cnt: (0, 0)),
            ],
            out_specs=pl.BlockSpec((node_tile, out_dim),
                                   lambda i, k, clo, cnt: (i, 0)),
            scratch_shapes=[pltpu.VMEM((node_tile, n_heads), jnp.float32)],
        ),
        compiler_params=pltpu.CompilerParams(
            dimension_semantics=("parallel", "arbitrary")),
    )(chunk_lo, n_chunks, dst_pad, sc_pad, v_s, hexp)

    # ---- K4: output head + residual -----------------------------------------
    o_w1a = params["o_w1"][:out_dim]
    o_w1h = params["o_w1"][out_dim:]
    out_w = [o_w1a, o_w1h, params["o_b1"], params["o_ln_g"], params["o_ln_b"],
             params["o_w2"], params["o_b2"]]
    out = pl.pallas_call(
        _out_kernel,
        out_shape=jax.ShapeDtypeStruct((N_pad, hidden), jnp.float32),
        grid_spec=pltpu.PrefetchScalarGridSpec(
            num_scalar_prefetch=0, grid=(nT,),
            in_specs=[pl.BlockSpec((node_tile, out_dim), lambda i: (i, 0)),
                      pl.BlockSpec((node_tile, in_dim), lambda i: (i, 0))]
                     + [pl.BlockSpec(w.shape, full) for w in out_w],
            out_specs=pl.BlockSpec((node_tile, hidden), lambda i: (i, 0)),
        ),
        compiler_params=pltpu.CompilerParams(dimension_semantics=("parallel",)),
    )(aggr, h_pad, *out_w)

    return out[:N]


# ----------------------------------------------------------------------------
# Pure-JAX reference
# ----------------------------------------------------------------------------
def _ref_forward(h, r_feat, edge_feat, edge_index, params, n_heads):
    src, dst = edge_index[0], edge_index[1]
    N = h.shape[0]

    def mlp(x, pre):
        y = x @ params[pre + "_w1"] + params[pre + "_b1"]
        mu = y.mean(-1, keepdims=True)
        var = ((y - mu) ** 2).mean(-1, keepdims=True)
        y = (y - mu) * jax.lax.rsqrt(var + 1e-5) * params[pre + "_ln_g"] + params[pre + "_ln_b"]
        y = jnp.maximum(y, 0.0)
        return y @ params[pre + "_w2"] + params[pre + "_b2"]

    kv = jnp.concatenate([edge_feat, r_feat, h[dst], h[src]], axis=-1)
    k = mlp(kv, "k")
    v = mlp(kv, "v")
    q = mlp(h, "q")
    e_w = jax.nn.sigmoid(r_feat @ params["ew_w"] + params["ew_b"])
    v = v * e_w

    D = k.shape[-1]
    hd = D // n_heads
    kh = k.reshape(-1, n_heads, hd)
    vh = v.reshape(-1, n_heads, hd)
    qh = q.reshape(-1, n_heads, hd)

    scores = (qh[dst] * kh).sum(-1) / np.sqrt(hd)
    m = jax.ops.segment_max(scores, dst, num_segments=N)
    p = jnp.exp(scores - m[dst])
    denom = jax.ops.segment_sum(p, dst, num_segments=N)
    alpha = p / denom[dst]

    msg = alpha[..., None] * vh
    out = jax.ops.segment_sum(msg, dst, num_segments=N).reshape(N, D)
    out = mlp(jnp.concatenate([out, h], axis=-1), "o")
    return out + h


# ----------------------------------------------------------------------------
def _init_params(key, in_dim, hidden, out_dim, ef_dim, rf_dim):
    kv_dim = 2 * in_dim + ef_dim + rf_dim
    ks = iter(jax.random.split(key, 64))
    n = lambda shape, s=0.2: (s * jax.random.normal(next(ks), shape)).astype(jnp.float32)
    lng = lambda: (1.0 + 0.1 * jax.random.normal(next(ks), (1, hidden))).astype(jnp.float32)
    lnb = lambda: (0.1 * jax.random.normal(next(ks), (1, hidden))).astype(jnp.float32)
    p = {}
    for pre, d_in in (("k", kv_dim), ("v", kv_dim), ("q", in_dim)):
        p[pre + "_w1"] = n((d_in, hidden)); p[pre + "_b1"] = n((1, hidden))
        p[pre + "_ln_g"] = lng();           p[pre + "_ln_b"] = lnb()
        p[pre + "_w2"] = n((hidden, out_dim)); p[pre + "_b2"] = n((1, out_dim))
    p["ew_w"] = n((rf_dim, 1)); p["ew_b"] = n((1, 1))
    # node_output = MLP(output_dim + input_dim (= 2*hidden), hidden, hidden)
    p["o_w1"] = n((out_dim + in_dim, hidden)); p["o_b1"] = n((1, hidden))
    p["o_ln_g"] = lng(); p["o_ln_b"] = lnb()
    p["o_w2"] = n((hidden, hidden)); p["o_b2"] = n((1, hidden))
    return p


if __name__ == "__main__":
    N, E = 96, 400
    in_dim = hidden_dim = out_dim = 32
    n_heads = 4
    ef_dim, rf_dim = 8, 16

    key = jax.random.PRNGKey(0)
    kh, kr, ke, ksrc, kdst, kp = jax.random.split(key, 6)
    h = jax.random.normal(kh, (N, in_dim), dtype=jnp.float32)
    r_feat = jax.random.normal(kr, (E, rf_dim), dtype=jnp.float32)
    edge_feat = jax.random.normal(ke, (E, ef_dim), dtype=jnp.float32)
    src = jax.random.randint(ksrc, (E,), 0, N, dtype=jnp.int32)
    dst = jax.random.randint(kdst, (E,), 0, N, dtype=jnp.int32)
    edge_index = jnp.stack([src, dst], axis=0)

    params = _init_params(kp, in_dim, hidden_dim, out_dim, ef_dim, rf_dim)

    # small tiles here to exercise the multi-tile / multi-chunk segmented path
    # at toy sizes; real-size defaults are node_tile=128, edge_tile=512.
    out = base_x2h_att_forward(h, r_feat, edge_feat, edge_index, params,
                               n_heads=n_heads, node_tile=32, edge_tile=128)
    out = jax.block_until_ready(out)

    ref = _ref_forward(h, r_feat, edge_feat, edge_index, params, n_heads)
    np.testing.assert_allclose(np.asarray(out), np.asarray(ref),
                               rtol=1e-3, atol=1e-3)
    print("KERNEL_OK")
</pallas_src>

<mosaic_0001>
module attributes {stable_mosaic.version = 11 : i64} {
  func.func @_hq_kernel(%arg0: i32, %arg1: memref<32x32xf32, #tpu.memory_space<vmem>>, %arg2: memref<32x32xf32, #tpu.memory_space<vmem>>, %arg3: memref<1x32xf32, #tpu.memory_space<vmem>>, %arg4: memref<1x32xf32, #tpu.memory_space<vmem>>, %arg5: memref<1x32xf32, #tpu.memory_space<vmem>>, %arg6: memref<32x32xf32, #tpu.memory_space<vmem>>, %arg7: memref<1x32xf32, #tpu.memory_space<vmem>>, %arg8: memref<32x32xf32, #tpu.memory_space<vmem>>) attributes {dimension_semantics = [#tpu.dimension_semantics<parallel>], iteration_bounds = array<i64: 3>, scalar_prefetch = 0 : i64, scratch_operands = 0 : i64, tpu.core_type = #tpu.core_type<tc>, window_params = [{transform_indices = @transform_0, window_bounds = array<i64: 32, 32>}, {pipeline_mode = #tpu.pipeline_mode<synchronous>, transform_indices = @transform_1, window_bounds = array<i64: 32, 32>}, {pipeline_mode = #tpu.pipeline_mode<synchronous>, transform_indices = @transform_2, window_bounds = array<i64: 1, 32>}, {pipeline_mode = #tpu.pipeline_mode<synchronous>, transform_indices = @transform_3, window_bounds = array<i64: 1, 32>}, {pipeline_mode = #tpu.pipeline_mode<synchronous>, transform_indices = @transform_4, window_bounds = array<i64: 1, 32>}, {pipeline_mode = #tpu.pipeline_mode<synchronous>, transform_indices = @transform_5, window_bounds = array<i64: 32, 32>}, {pipeline_mode = #tpu.pipeline_mode<synchronous>, transform_indices = @transform_6, window_bounds = array<i64: 1, 32>}, {transform_indices = @transform_7, window_bounds = array<i64: 32, 32>}]} {
    %c0 = arith.constant 0 : index
    %c0_0 = arith.constant 0 : index
    %0 = vector.load %arg1[%c0, %c0_0] : memref<32x32xf32, #tpu.memory_space<vmem>>, vector<32x32xf32>
    %c0_1 = arith.constant 0 : index
    %c0_2 = arith.constant 0 : index
    %1 = vector.load %arg2[%c0_1, %c0_2] : memref<32x32xf32, #tpu.memory_space<vmem>>, vector<32x32xf32>
    %cst = arith.constant dense<0.000000e+00> : vector<32x32xf32>
    %2 = tpu.matmul %0, %1, %cst {dimension_numbers = #tpu.dot_dimension_numbers<[1], [0], [0], [1], [0, 0, 1, 1], [], []>} : vector<32x32xf32>, vector<32x32xf32>, vector<32x32xf32> -> vector<32x32xf32>
    %c0_3 = arith.constant 0 : index
    %c0_4 = arith.constant 0 : index
    %3 = vector.load %arg3[%c0_3, %c0_4] : memref<1x32xf32, #tpu.memory_space<vmem>>, vector<1x32xf32>
    %4 = vector.broadcast %3 : vector<1x32xf32> to vector<32x32xf32>
    %5 = arith.addf %2, %4 : vector<32x32xf32>
    %c0_5 = arith.constant 0 : index
    %c0_6 = arith.constant 0 : index
    %6 = vector.load %arg4[%c0_5, %c0_6] : memref<1x32xf32, #tpu.memory_space<vmem>>, vector<1x32xf32>
    %c0_7 = arith.constant 0 : index
    %c0_8 = arith.constant 0 : index
    %7 = vector.load %arg5[%c0_7, %c0_8] : memref<1x32xf32, #tpu.memory_space<vmem>>, vector<1x32xf32>
    %cst_9 = arith.constant dense<0.000000e+00> : vector<32xf32>
    %8 = vector.multi_reduction <add>, %5, %cst_9 [1] : vector<32x32xf32> to vector<32xf32>
    %9 = vector.shape_cast %8 : vector<32xf32> to vector<32x1xf32>
    %cst_10 = arith.constant 3.200000e+01 : f32
    %10 = vector.broadcast %cst_10 : f32 to vector<32x1xf32>
    %11 = arith.divf %9, %10 : vector<32x1xf32>
    %12 = vector.broadcast %11 : vector<32x1xf32> to vector<32x32xf32>
    %13 = arith.subf %5, %12 : vector<32x32xf32>
    %14 = arith.mulf %13, %13 : vector<32x32xf32>
    %cst_11 = arith.constant dense<0.000000e+00> : vector<32xf32>
    %15 = vector.multi_reduction <add>, %14, %cst_11 [1] : vector<32x32xf32> to vector<32xf32>
    %16 = vector.shape_cast %15 : vector<32xf32> to vector<32x1xf32>
    %cst_12 = arith.constant 3.200000e+01 : f32
    %17 = vector.broadcast %cst_12 : f32 to vector<32x1xf32>
    %18 = arith.divf %16, %17 : vector<32x1xf32>
    %19 = vector.broadcast %11 : vector<32x1xf32> to vector<32x32xf32>
    %20 = arith.subf %5, %19 : vector<32x32xf32>
    %cst_13 = arith.constant 9.99999974E-6 : f32
    %21 = vector.broadcast %cst_13 : f32 to vector<32x1xf32>
    %22 = arith.addf %18, %21 : vector<32x1xf32>
    %23 = math.rsqrt %22 : vector<32x1xf32>
    %24 = vector.broadcast %23 : vector<32x1xf32> to vector<32x32xf32>
    %25 = arith.mulf %20, %24 : vector<32x32xf32>
    %26 = vector.broadcast %6 : vector<1x32xf32> to vector<32x32xf32>
    %27 = arith.mulf %25, %26 : vector<32x32xf32>
    %28 = vector.broadcast %7 : vector<1x32xf32> to vector<32x32xf32>
    %29 = arith.addf %27, %28 : vector<32x32xf32>
    %cst_14 = arith.constant 0.000000e+00 : f32
    %30 = vector.broadcast %cst_14 : f32 to vector<32x32xf32>
    %31 = arith.maximumf %29, %30 : vector<32x32xf32>
    %c0_15 = arith.constant 0 : index
    %c0_16 = arith.constant 0 : index
    %32 = vector.load %arg6[%c0_15, %c0_16] : memref<32x32xf32, #tpu.memory_space<vmem>>, vector<32x32xf32>
    %cst_17 = arith.constant dense<0.000000e+00> : vector<32x32xf32>
    %33 = tpu.matmul %31, %32, %cst_17 {dimension_numbers = #tpu.dot_dimension_numbers<[1], [0], [0], [1], [0, 0, 1, 1], [], []>} : vector<32x32xf32>, vector<32x32xf32>, vector<32x32xf32> -> vector<32x32xf32>
    %c0_18 = arith.constant 0 : index
    %c0_19 = arith.constant 0 : index
    %34 = vector.load %arg7[%c0_18, %c0_19] : memref<1x32xf32, #tpu.memory_space<vmem>>, vector<1x32xf32>
    %35 = vector.broadcast %34 : vector<1x32xf32> to vector<32x32xf32>
    %36 = arith.addf %33, %35 : vector<32x32xf32>
    %c0_20 = arith.constant 0 : index
    %c0_21 = arith.constant 0 : index
    %37 = vector.load %arg8[%c0_20, %c0_21] : memref<32x32xf32, #tpu.memory_space<vmem>>, vector<32x32xf32>
    tpu.vector_store %arg8[%c0_20, %c0_21], %36 {strides = array<i32>} : memref<32x32xf32, #tpu.memory_space<vmem>>, vector<32x32xf32>,
    return
  }
  func.func @transform_0(%arg0: i32) -> (i32, i32) {
    %c0_i32 = arith.constant 0 : i32
    %c0_i32_0 = arith.constant 0 : i32
    return %arg0, %c0_i32 : i32, i32
  }
  func.func @transform_1(%arg0: i32) -> (i32, i32) {
    %c0_i32 = arith.constant 0 : i32
    %c0_i32_0 = arith.constant 0 : i32
    %c0_i32_1 = arith.constant 0 : i32
    return %c0_i32, %c0_i32_0 : i32, i32
  }
  func.func @transform_2(%arg0: i32) -> (i32, i32) {
    %c0_i32 = arith.constant 0 : i32
    %c0_i32_0 = arith.constant 0 : i32
    %c0_i32_1 = arith.constant 0 : i32
    return %c0_i32, %c0_i32_0 : i32, i32
  }
  func.func @transform_3(%arg0: i32) -> (i32, i32) {
    %c0_i32 = arith.constant 0 : i32
    %c0_i32_0 = arith.constant 0 : i32
    %c0_i32_1 = arith.constant 0 : i32
    return %c0_i32, %c0_i32_0 : i32, i32
  }
  func.func @transform_4(%arg0: i32) -> (i32, i32) {
    %c0_i32 = arith.constant 0 : i32
    %c0_i32_0 = arith.constant 0 : i32
    %c0_i32_1 = arith.constant 0 : i32
    return %c0_i32, %c0_i32_0 : i32, i32
  }
  func.func @transform_5(%arg0: i32) -> (i32, i32) {
    %c0_i32 = arith.constant 0 : i32
    %c0_i32_0 = arith.constant 0 : i32
    %c0_i32_1 = arith.constant 0 : i32
    return %c0_i32, %c0_i32_0 : i32, i32
  }
  func.func @transform_6(%arg0: i32) -> (i32, i32) {
    %c0_i32 = arith.constant 0 : i32
    %c0_i32_0 = arith.constant 0 : i32
    %c0_i32_1 = arith.constant 0 : i32
    return %c0_i32, %c0_i32_0 : i32, i32
  }
  func.func @transform_7(%arg0: i32) -> (i32, i32) {
    %c0_i32 = arith.constant 0 : i32
    %c0_i32_0 = arith.constant 0 : i32
    return %arg0, %c0_i32 : i32, i32
  }
}

</mosaic_0001>

<bundles_post_ra>
// kernel: tpu_custom_call.1
= control target key start
LH: loop header
LB: loop body
LE: loop exit
PB: predicated region body
PF: predicated region fallthrough
CT: control target
= control target key end

     0   :  { %s789_s24 = smov 0   ;;  %s869_s0 = inlined_call_operand.vmem [shape: f32[96,32], index: 0, kind: input, shape index: {}]   ;;  %s870_s1 = inlined_call_operand.vmem [shape: f32[32,32], index: 1, kind: input, shape index: {}]   ;;  %s871_s2 = inlined_call_operand.vmem [shape: f32[1,32], index: 2, kind: input, shape index: {}]   ;;  %s872_s3 = inlined_call_operand.vmem [shape: f32[1,32], index: 3, kind: input, shape index: {}]   ;;  %s873_s4 = inlined_call_operand.vmem [shape: f32[1,32], index: 4, kind: input, shape index: {}]   ;;  %s874_s5 = inlined_call_operand.vmem [shape: f32[32,32], index: 5, kind: input, shape index: {}]   ;;  %s875_s6 = inlined_call_operand.vmem [shape: f32[1,32], index: 6, kind: input, shape index: {}]   ;;  %s876_s7 = inlined_call_operand.vmem [shape: f32[96,32], index: 7, kind: output, shape index: {}]  }
   0x1 LB: > { %s642_s25 = sadd.s32 4294967295, %s747_s24   ;;  %p646_p0 = scmp.ge.s32.totalorder %s747_s24, 1  ;;  %s747_s24 = sphi %s789_s24, %s17_s24  }
   0x2   : > { %p238_p1 = scmp.lt.s32.totalorder %s747_s24, 4 }
   0x4   : > { %p239_p2 = pnand %p646_p0, %p238_p1 }
   0x5   : > { %v286_v0 = vld [vmem:[%s870_s1] sm:$0xff] (!%p239_p2)  ;;  %v287_v1 = vld [vmem:[%s870_s1 + $0x8] sm:$0xff] (!%p239_p2)  ;;  %v288_v2 = vld [vmem:[%s870_s1 + $0x10] sm:$0xff] (!%p239_p2)  ;;  %s647_s9 = sshll.u32 (!%p239_p2), %s642_s25, 2  ;;  %vm297_vm0 = vcmask (!%p239_p2), 261120  }
   0x6   : > { %242 = sbr.rel (%p239_p2) target bundleno = 772 (0x304), region = 48  ;;  %v709_v3 = vpack.c.bf16 (!%p239_p2), %v287_v1, %v286_v0  ;;  %v289_v4 = vld [vmem:[%s870_s1 + $0x18] sm:$0xff] (!%p239_p2)  ;;  %p271_p3 = scmp.lt.s32.totalorder (!%p239_p2), %s647_s9, 11  ;;  %v651_v10 = vld [vmem:[%s871_s2] ss:$0 sm:$0xff] (!%p239_p2)  ;;  %v475_v44 = vld [vmem:[%s874_s5 + $0x8] sm:$0xff] (!%p239_p2) }
   0x7   : > { %v713_v5 = vpack.c.bf16 (!%p239_p2), %v289_v4, %v288_v2  ;;  %v474_v43 = vld [vmem:[%s874_s5] sm:$0xff] (!%p239_p2)  ;;  %v476_v46 = vld [vmem:[%s874_s5 + $0x10] sm:$0xff] (!%p239_p2)  ;;  %v477_v47 = vld [vmem:[%s874_s5 + $0x18] sm:$0xff] (!%p239_p2) }
   0x8   : > { %710 = vmatprep.subr.bf16.mxu0 (!%p239_p2), %v709_v3  ;;  %v717_v45 = vpack.c.bf16 (!%p239_p2), %v475_v44, %v474_v43  ;;  %v721_v48 = vpack.c.bf16 (!%p239_p2), %v477_v47, %v476_v46  ;;  %v656_v62 = vld [vmem:[%s872_s3] ss:$0 sm:$0xff] (!%p239_p2) }
   0x9   : > { %712 = vmatpush3.bf16.msra.mxu0 (!%p239_p2), %v709_v3  ;;  %v657_v0 = vld [vmem:[%s873_s4] ss:$0 sm:$0xff] (!%p239_p2) }
   0xa   : > { %714 = vmatprep.subr.bf16.mxu0 (!%p239_p2), %v713_v5  ;;  %718 = vmatprep.subr.bf16.mxu1 (!%p239_p2), %v717_v45 }
   0xb   : > { %720 = vmatpush3.bf16.msra.mxu1 (!%p239_p2), %v717_v45 }
   0xc   : > { %722 = vmatprep.subr.bf16.mxu1 (!%p239_p2), %v721_v48 }
   0xd   : > { %s878_s9 = smov (!%p271_p3, %s647_s9), 11  ;;  %716 = vmatpush3.bf16.msra.mxu0 %v713_v5 }
   0xe   : > { %s648_s12 = sshll.u32 %s878_s9, 3 }
   0xf   : > { %s274_s15 = scalar_lea.vmem %s869_s0, %s648_s12  ;;  %724 = vmatpush3.bf16.msra.mxu1 %v721_v48  ;;  %s280_s14 = scalar_lea.vmem %s876_s7, %s648_s12 }
  0x10   : > { %v282_v6 = vld [vmem:[%s274_s15] sm:$0xff]  ;;  %v283_v7 = vld [vmem:[%s274_s15 + $0x8] sm:$0xff]  ;;  %v284_v8 = vld [vmem:[%s274_s15 + $0x10] sm:$0xff] }
  0x11   : > { %689 = vmatprep.mubr.msk.f32.mxu0 %vm297_vm0, %v282_v6  ;;  %v285_v9 = vld [vmem:[%s274_s15 + $0x18] sm:$0xff] }
  0x12   : > { %690 = vmatmul.mubr.msk.f32.vlgmr.msra.gmra.mrb[0].mxu0 %vm297_vm0, %v283_v7 }
  0x13   : > { %692 = vmatprep.mubr.msk.f32.mxu0 %vm297_vm0, %v284_v8 }
  0x16   : > { %693 = vmatmul.mubr.msk.f32.gmra.mrb[2].mxu0 %vm297_vm0, %v285_v9 }
  0xe5   : > { %v691_v11 = vpop.f32.mrb[0].mxu0 }
  0xe6   : > { %v376_v12 = vpop.f32.mrb[1].mxu0  ;;  %v382_v14 = vadd.f32 %v691_v11, %v651_v10 }
  0xe7   : > { %v377_v13 = vadd.f32 %v651_v10, %v376_v12 }
  0xe8   : > { %v400_v21 = vsel %vm297_vm0, %v382_v14, 0.0 }
  0xe9   : > { %v694_v15 = vpop.f32.mrb[2].mxu0  ;;  %v397_v16 = vsel %vm297_vm0, %v377_v13, 0.0 }
  0xea   : > { %v386_v17 = vpop.f32.mrb[3].mxu0  ;;  %398 = vadd.xlane.f32.xlu0 %v397_v16  ;;  %v392_v19 = vadd.f32 %v694_v15, %v651_v10 }
  0xeb   : > { %v387_v18 = vadd.f32 %v651_v10, %v386_v17 }
  0xec   : > { %v406_v22 = vsel %vm297_vm0, %v392_v19, 0.0 }
  0xed   : > { %v403_v20 = vsel %vm297_vm0, %v387_v18, 0.0 }
  0xee   : > { %404 = vadd.xlane.f32.xlu1 %v403_v20  ;;  %401 = vadd.xlane.f32.xlu0 %v400_v21 }
  0xf2   : > { %407 = vadd.xlane.f32.xlu1 %v406_v22 }
 0x177   : > { %v399_v23 = vpop.xlane.xlu0 %398 }
 0x178   : > { %v410_v24 = vmul.f32 0.03125, %v399_v23 }
 0x17a   : > { %v414_v25 = vsub.f32 %v377_v13, %v410_v24 }
 0x17b   : > { %v405_v26 = vpop.xlane.xlu1 %404  ;;  %v402_v27 = vpop.xlane.xlu0 %401 }
 0x17c   : > { %v412_v28 = vmul.f32 0.03125, %v405_v26  ;;  %v411_v29 = vmul.f32 0.03125, %v402_v27  ;;  %v418_v30 = vmul.f32 %v414_v25, %v414_v25 }
 0x17e   : > { %v416_v31 = vsub.f32 %v387_v18, %v412_v28  ;;  %v415_v32 = vsub.f32 %v382_v14, %v411_v29  ;;  %v422_v33 = vsel %vm297_vm0, %v418_v30, 0.0 }
 0x17f   : > { %v408_v34 = vpop.xlane.xlu1 %407  ;;  %423 = vadd.xlane.f32.xlu0 %v422_v33 }
 0x180   : > { %v413_v35 = vmul.f32 0.03125, %v408_v34  ;;  %v420_v36 = vmul.f32 %v416_v31, %v416_v31  ;;  %v419_v37 = vmul.f32 %v415_v32, %v415_v32 }
 0x182   : > { %v417_v38 = vsub.f32 %v392_v19, %v413_v35  ;;  %v428_v39 = vsel %vm297_vm0, %v420_v36, 0.0  ;;  %v425_v40 = vsel %vm297_vm0, %v419_v37, 0.0  ;;  %v658_v19 = vld [vmem:[%s875_s6] ss:$0 sm:$0xff] }
 0x183   : > { %429 = vadd.xlane.f32.xlu0 %v428_v39  ;;  %426 = vadd.xlane.f32.xlu1 %v425_v40 }
 0x184   : > { %v421_v41 = vmul.f32 %v417_v38, %v417_v38 }
 0x186   : > { %v431_v42 = vsel %vm297_vm0, %v421_v41, 0.0 }
 0x187   : > { %432 = vadd.xlane.f32.xlu1 %v431_v42 }
 0x20c   : > { %v424_v49 = vpop.xlane.xlu0 %423 }
 0x20d   : > { %v434_v50 = vmul.f32 0.03125, %v424_v49 }
 0x20f   : > { %v438_v51 = vadd.f32 1e-05, %v434_v50 }
 0x210   : > { %v427_v52 = vpop.xlane.xlu1 %426  ;;  %v430_v53 = vpop.xlane.xlu0 %429 }
 0x211   : > { %733 = vrsqrt.f32 %v438_v51  ;;  %v435_v54 = vmul.f32 0.03125, %v427_v52  ;;  %v436_v55 = vmul.f32 0.03125, %v430_v53 }
 0x213   : > { %v439_v56 = vadd.f32 1e-05, %v435_v54  ;;  %v440_v57 = vadd.f32 1e-05, %v436_v55 }
 0x214   : > { %v433_v58 = vpop.xlane.xlu1 %432 }
 0x215   : > { %735 = vrsqrt.f32 %v439_v56  ;;  %v437_v59 = vmul.f32 0.03125, %v433_v58 }
 0x216   : > { %737 = vrsqrt.f32 %v440_v57 }
 0x217   : > { %v441_v60 = vadd.f32 1e-05, %v437_v59 }
 0x219   : > { %739 = vrsqrt.f32 %v441_v60 }
 0x21b   : > { %v734_v61 = vpop.eup %733 }
 0x21c   : > { %v446_v63 = vmul.f32 %v734_v61, %v414_v25 }
 0x21e   : > { %v456_v1 = vmul.f32 %v656_v62, %v446_v63 }
 0x21f   : > { %v736_v2 = vpop.eup %735 }
 0x220   : > { %v738_v3 = vpop.eup %737  ;;  %v466_v4 = vadd.f32 %v657_v0, %v456_v1  ;;  %v447_v5 = vmul.f32 %v736_v2, %v415_v32 }
 0x221   : > { %v448_v6 = vmul.f32 %v738_v3, %v416_v31 }
 0x222   : > { %v470_v7 = vmax.f32 %v466_v4, 0.0  ;;  %v457_v8 = vmul.f32 %v656_v62, %v447_v5 }
 0x223   : > { %v740_v9 = vpop.eup %739  ;;  %v458_v10 = vmul.f32 %v656_v62, %v448_v6 }
 0x224   : > { %v449_v11 = vmul.f32 %v740_v9, %v417_v38  ;;  %703 = vmatprep.mubr.msk.f32.mxu1 %vm297_vm0, %v470_v7  ;;  %v467_v12 = vadd.f32 %v657_v0, %v457_v8 }
 0x225   : > { %v468_v13 = vadd.f32 %v657_v0, %v458_v10 }
 0x226   : > { %v471_v14 = vmax.f32 %v467_v12, 0.0  ;;  %v459_v15 = vmul.f32 %v656_v62, %v449_v11 }
 0x227   : > { %v472_v16 = vmax.f32 %v468_v13, 0.0 }
 0x228   : > { %704 = vmatmul.mubr.msk.f32.vlgmr.msra.gmra.mrb[0].mxu1 %vm297_vm0, %v471_v14  ;;  %v469_v17 = vadd.f32 %v657_v0, %v459_v15 }
 0x229   : > { %706 = vmatprep.mubr.msk.f32.mxu1 %vm297_vm0, %v472_v16 }
 0x22a   : > { %v473_v18 = vmax.f32 %v469_v17, 0.0 }
 0x22c   : > { %707 = vmatmul.mubr.msk.f32.gmra.mrb[2].mxu1 %vm297_vm0, %v473_v18 }
 0x2fb   : > { %v705_v20 = vpop.f32.mrb[0].mxu1 }
 0x2fc   : > { %v569_v21 = vadd.f32 %v705_v20, %v658_v19  ;;  %v563_v22 = vpop.f32.mrb[1].mxu1 }
 0x2fd   : > { %v564_v23 = vadd.f32 %v658_v19, %v563_v22 }
 0x2fe   : > { %583 = vst.msk [vmem:[%s280_s14 + $0x8] sm:$0xff] %vm297_vm0, %v569_v21 }
 0x2ff   : > { %582 = vst.msk [vmem:[%s280_s14] sm:$0xff] %vm297_vm0, %v564_v23  ;;  %v708_v24 = vpop.f32.mrb[2].mxu1 }
 0x300   : > { %v579_v25 = vadd.f32 %v708_v24, %v658_v19  ;;  %v573_v26 = vpop.f32.mrb[3].mxu1 }
 0x301   : > { %v574_v27 = vadd.f32 %v658_v19, %v573_v26 }
 0x302   : > { %585 = vst.msk [vmem:[%s280_s14 + $0x18] sm:$0xff] %vm297_vm0, %v579_v25 }
 0x303   : > { %584 = vst.msk [vmem:[%s280_s14 + $0x10] sm:$0xff] %vm297_vm0, %v574_v27 }
 0x304 PF: > { %s17_s24 = sadd.s32 1, %s747_s24  }
 0x305   : > { %p14_p4 = scmp.ge.s32.totalorder %s17_s24, 5  }
 0x307   :  { %16 = sbr.rel (!%p14_p4) target bundleno = 1 (0x1), region = 78 }

</bundles_post_ra>
